<compile_context>
chip_gen: v5e
topology: v5e:2x2
jax: 0.10.0
libtpu: 0.0.40
codegen_flags: <defaults>
</compile_context>

<pallas_src>
import jax
import jax.numpy as jnp
from jax.experimental import pallas as pl
from jax.experimental.pallas import tpu as pltpu


def _pool_upsample_kernel(x_ref, a_ref, b_ref):
    # x_ref: (TH, 2*W)  -- each row = [input row 2h, input row 2h+1] concatenated
    # a_ref: (TH, W/2)  -- MaxPool2d(2,2) output rows
    # b_ref: (TH, 2*W)  -- each row = [upsampled row, upsampled row] (both H parities)
    xb = x_ref[...]                                   # (TH, 2W), lane/sublane dense
    th, w2 = xb.shape
    w = w2 // 2
    wh = w // 2

    # MaxPool2d(2,2), H direction: the row pair lives in the two lane halves.
    hmax = jnp.maximum(xb[:, :w], xb[:, w:])          # (TH, W)

    # MaxPool2d(2,2), W direction: pair adjacent lanes, reduce the size-2 minor.
    a = jnp.max(hmax.reshape(th, wh, 2), axis=-1)     # (TH, W/2)
    a_ref[...] = a

    # Upsample(scale=2, nearest), W direction: duplicate each pooled value to a lane pair.
    bw = jnp.broadcast_to(a[:, :, None], (th, wh, 2)).reshape(th, w)   # (TH, W)

    # Upsample, H direction: both output row parities get the same row -> one dense store.
    b_ref[...] = jnp.concatenate([bw, bw], axis=-1)   # (TH, 2W)


def _divisors(n):
    ds = set()
    d = 1
    while d * d <= n:
        if n % d == 0:
            ds.add(d)
            ds.add(n // d)
        d += 1
    return sorted(ds)


def _choose_tile(n_rows, bytes_per_row, budget_bytes):
    # TH must divide n_rows and be a multiple of 8 (sublane rule) unless it spans all rows.
    cands = [d for d in _divisors(n_rows) if d % 8 == 0 or d == n_rows]
    fitting = [d for d in cands if 2 * d * bytes_per_row <= budget_bytes]  # x2 double-buffer
    if not fitting:
        fitting = [cands[0]]
    # Prefer >= 2 grid steps (keeps both v7x TensorCores busy) when a fitting tile allows it.
    multi = [d for d in fitting if n_rows // d >= 2]
    return multi[-1] if multi else fitting[-1]


def simple_conv_model_forward(x, *, vmem_budget_bytes=16 * 1024 * 1024):
    """x: (N, C, H, W) -> (a, b) with a = (N, C, H/2, W/2), b = (N, C, H, W)."""
    N, C, H, W = x.shape
    if H % 2 or W % 2:
        # PyTorch MaxPool2d(2,2) floors odd sizes (drops last row/col); not implemented here.
        raise ValueError("simple_conv_model_forward requires even H and W")
    Hh, Wh = H // 2, W // 2
    R = N * C * Hh                      # one row per pooled output row
    W2 = 2 * W

    # Free, contiguous row-major reshape: no transpose, no extra HBM traffic.
    xv = x.reshape(R, W2)

    itemsize = jnp.dtype(x.dtype).itemsize
    bytes_per_row = itemsize * (W2 + W2 + Wh)          # x tile + b tile + a tile, per row
    th = _choose_tile(R, bytes_per_row, vmem_budget_bytes)
    grid = (R // th,)

    bytes_accessed = itemsize * (R * W2 + R * Wh + R * W2)   # read x, write a, write b

    a_flat, b_flat = pl.pallas_call(
        _pool_upsample_kernel,
        out_shape=(
            jax.ShapeDtypeStruct((R, Wh), x.dtype),
            jax.ShapeDtypeStruct((R, W2), x.dtype),
        ),
        grid=grid,
        in_specs=[pl.BlockSpec((th, W2), lambda i: (i, 0))],
        out_specs=(
            pl.BlockSpec((th, Wh), lambda i: (i, 0)),
            pl.BlockSpec((th, W2), lambda i: (i, 0)),
        ),
        compiler_params=pltpu.CompilerParams(
            dimension_semantics=("parallel",),
            vmem_limit_bytes=32 * 1024 * 1024,
        ),
        cost_estimate=pl.CostEstimate(
            flops=2 * R * W,            # ~one max per output element (no MXU work)
            transcendentals=0,
            bytes_accessed=bytes_accessed,
        ),
    )(xv)

    a = a_flat.reshape(N, C, Hh, Wh)    # free reshapes back to NCHW-style shapes
    b = b_flat.reshape(N, C, H, W)

    # TODO(synk): torch.cat([a, b]) in the reference raises a RuntimeError (a and b have
    # different spatial shapes, so non-cat dims mismatch); we return the pair (a, b).
    return a, b


if __name__ == "__main__":
    key = jax.random.PRNGKey(0)
    k_x, k_w = jax.random.split(key)

    # Parameters of self.enc0 = nn.Conv2d(3, 3, 3, padding='same'): initialized for parity
    # with the reference __init__, but (like the reference forward) never used.
    enc0_weight = 0.1 * jax.random.normal(k_w, (3, 3, 3, 3), jnp.float32)
    enc0_bias = jnp.zeros((3,), jnp.float32)

    # Input consistent with Conv2d(3, ...): NCHW, batch=2, channels=3, spatial=16.
    x = jax.random.normal(k_x, (2, 3, 16, 16), jnp.float32)

    a, b = jax.jit(simple_conv_model_forward)(x)
    jax.block_until_ready((a, b))

    # Pure-JAX reference: MaxPool2d(2,2) + nearest x2 upsample.
    N, C, H, W = x.shape
    a_ref = jnp.max(x.reshape(N, C, H // 2, 2, W // 2, 2), axis=(3, 5))
    b_ref = jnp.repeat(jnp.repeat(a_ref, 2, axis=2), 2, axis=3)
    assert a.shape == (N, C, H // 2, W // 2) and b.shape == (N, C, H, W)
    assert jnp.allclose(a, a_ref) and jnp.allclose(b, b_ref)

    print("KERNEL_OK")
</pallas_src>

<mosaic_0001>
module attributes {stable_mosaic.version = 11 : i64} {
  func.func @_pool_upsample_kernel(%arg0: i32, %arg1: memref<24x32xf32, #tpu.memory_space<vmem>>, %arg2: memref<24x8xf32, #tpu.memory_space<vmem>>, %arg3: memref<24x32xf32, #tpu.memory_space<vmem>>) attributes {dimension_semantics = [#tpu.dimension_semantics<parallel>], iteration_bounds = array<i64: 2>, scalar_prefetch = 0 : i64, scratch_operands = 0 : i64, tpu.core_type = #tpu.core_type<tc>, window_params = [{transform_indices = @transform_0, window_bounds = array<i64: 24, 32>}, {transform_indices = @transform_1, window_bounds = array<i64: 24, 8>}, {transform_indices = @transform_2, window_bounds = array<i64: 24, 32>}]} {
    %c0 = arith.constant 0 : index
    %c0_0 = arith.constant 0 : index
    %0 = vector.load %arg1[%c0, %c0_0] : memref<24x32xf32, #tpu.memory_space<vmem>>, vector<24x32xf32>
    %1 = vector.extract_strided_slice %0 {offsets = [0, 0], sizes = [24, 16], strides = [1, 1]} : vector<24x32xf32> to vector<24x16xf32>
    %2 = vector.extract_strided_slice %0 {offsets = [0, 16], sizes = [24, 16], strides = [1, 1]} : vector<24x32xf32> to vector<24x16xf32>
    %3 = arith.maximumf %1, %2 : vector<24x16xf32>
    %4 = vector.shape_cast %3 : vector<24x16xf32> to vector<24x8x2xf32>
    %cst = arith.constant dense<0xFF800000> : vector<24x8xf32>
    %5 = vector.multi_reduction <maximumf>, %4, %cst [2] : vector<24x8x2xf32> to vector<24x8xf32>
    %c0_1 = arith.constant 0 : index
    %c0_2 = arith.constant 0 : index
    %6 = vector.load %arg2[%c0_1, %c0_2] : memref<24x8xf32, #tpu.memory_space<vmem>>, vector<24x8xf32>
    tpu.vector_store %arg2[%c0_1, %c0_2], %5 {strides = array<i32>} : memref<24x8xf32, #tpu.memory_space<vmem>>, vector<24x8xf32>,
    %7 = vector.shape_cast %5 : vector<24x8xf32> to vector<24x8x1xf32>
    %8 = vector.shape_cast %7 : vector<24x8x1xf32> to vector<24x8x1xf32>
    %9 = vector.broadcast %8 : vector<24x8x1xf32> to vector<24x8x2xf32>
    %10 = vector.shape_cast %9 : vector<24x8x2xf32> to vector<24x16xf32>
    %11 = tpu.concatenate %10, %10 in 1 : vector<24x16xf32>, vector<24x16xf32> -> vector<24x32xf32>
    %c0_3 = arith.constant 0 : index
    %c0_4 = arith.constant 0 : index
    %12 = vector.load %arg3[%c0_3, %c0_4] : memref<24x32xf32, #tpu.memory_space<vmem>>, vector<24x32xf32>
    tpu.vector_store %arg3[%c0_3, %c0_4], %11 {strides = array<i32>} : memref<24x32xf32, #tpu.memory_space<vmem>>, vector<24x32xf32>,
    return
  }
  func.func @transform_0(%arg0: i32) -> (i32, i32) {
    %c0_i32 = arith.constant 0 : i32
    %c0_i32_0 = arith.constant 0 : i32
    return %arg0, %c0_i32 : i32, i32
  }
  func.func @transform_1(%arg0: i32) -> (i32, i32) {
    %c0_i32 = arith.constant 0 : i32
    %c0_i32_0 = arith.constant 0 : i32
    return %arg0, %c0_i32 : i32, i32
  }
  func.func @transform_2(%arg0: i32) -> (i32, i32) {
    %c0_i32 = arith.constant 0 : i32
    %c0_i32_0 = arith.constant 0 : i32
    return %arg0, %c0_i32 : i32, i32
  }
}

</mosaic_0001>

<bundles_post_ra>
// kernel: simple_conv_model_forward.1
= control target key start
LH: loop header
LB: loop body
LE: loop exit
PB: predicated region body
PF: predicated region fallthrough
CT: control target
= control target key end

     0   :  { %8 = vsyncpa [#allocation3], 0  ;;  %s2364_s0 = inlined_call_operand.vmem [shape: f32[48,32], index: 0, kind: input, shape index: {}]   ;;  %s2365_s1 = inlined_call_operand.hbm [shape: f32[48,8], index: 1, kind: output, shape index: {0}]   ;;  %s2366_s2 = inlined_call_operand.vmem [shape: f32[48,32], index: 2, kind: output, shape index: {1}]  }
   0x1   :  { %10 = vsyncpa [#allocation3 + $0x1], 0  ;;  %s1483_s9 = smov 0   ;;  %s1485_s10 = smov 0  }
   0x2   :  { %s1487_s11 = smov 0   ;;  %s1489_s12 = smov 0  }
   0x3 LB: > { %s1504_s13 = sadd.s32 4294967295, %s1447_s12   ;;  %s1316_s14 = sadd.s32 4294967294, %s1447_s12   ;;  %s1447_s12 = sphi %s1489_s12, %s2383_s12   ;;  %s1443_s11 = sphi %s1487_s11, %s2382_s11   ;;  %s1439_s10 = sphi %s1485_s10, %s2381_s10   ;;  %s1435_s9 = sphi %s1483_s9, %s2380_s9  }
   0x4   : > { %s1508_s15 = sadd.s32 1, %s1447_s12   ;;  %s49_s16 = sadd.s32 1, %s1443_s11 }
   0x5   : > { %s46_s17 = ssub.s32 %s1447_s12, %s1508_s15  ;;  %p59_p0 = scmp.ne.s32.totalorder %s1443_s11, %s1439_s10 }
   0x6   : > { %p47_p1 = scmp.eq.s32.totalorder %s46_s17, 0  ;;  %p60_p2 = scmp.eq.s32.totalorder %s1504_s13, 1 }
   0x7   : > { %p65_p3 = scmp.ne.s32.totalorder %s1439_s10, %s1435_s9  ;;  %p66_p4 = scmp.eq.s32.totalorder %s1316_s14, 1 }
   0x8   : > { %s1519_s18 = scalar_select %p47_p1, %s1443_s11, %s49_s16  }
   0x9   : > { %p1521_p5 = por %p60_p2, %p59_p0  ;;  %p1525_p6 = por %p66_p4, %p65_p3 }
   0xa   : > { %p1319_p7 = scmp.ge.s32.totalorder %s1447_s12, 1  ;;  %p119_p8 = scmp.lt.s32.totalorder %s1447_s12, 3 }
   0xc   : > { %p120_p9 = pnand %p1319_p7, %p119_p8 }
   0xd   : > { %s146_s21 = smul.u32 (!%p120_p9), 3, %s1504_s13  ;;  %s1449_s26 = smov (!%p120_p9), 112  }
   0xe   : > { %123 = sbr.rel (%p120_p9) target bundleno = 774 (0x306), region = 24  ;;  %s1450_s27 = smov (!%p120_p9), 124  }
   0xf   : > { %p147_p10 = scmp.lt.s32.totalorder (!%p120_p9), %s146_s21, 5  ;;  %s1451_s28 = smov (!%p120_p9), 126  }
  0x10   : > { %s1452_s29 = smov (!%p120_p9), 122   ;;  %s1453_s30 = smov (!%p120_p9), 120  }
  0x11   : > { %s1454_s3 = smov (!%p120_p9), 116   ;;  %s1455_s4 = smov (!%p120_p9), 118  }
  0x12   : > { %s1456_s5 = smov (!%p120_p9), 114   ;;  %s1459_s6 = smov (!%p120_p9), 2  }
  0x13   : > { %s2385_s21 = smov (!%p147_p10, %s146_s21), 5  ;;  %v1457_v19 = vmov 1983009808   ;;  %vm244_vm0 = vcmask 1047556   ;;  %v1458_v39 = vmov 1934713408  }
  0x14   : > { %s1320_s22 = sshll.u32 %s2385_s21, 3  ;;  %v249_v20 = vunpack.c.l.s4 %v1457_v19  ;;  %v297_v40 = vunpack.c.l.s4 %v1458_v39  ;;  %vm580_vm1 = vcmask 15360   ;;  %vm703_vm2 = vcmask 1041409   ;;  %s136_s7 = sand.u32 1, %s1439_s10  }
  0x15   : > { %s150_s25 = scalar_lea.vmem %s2364_s0, %s1320_s22  ;;  %vm705_vm3 = vcmask 1042434   ;;  %vm707_vm4 = vcmask 1043459   ;;  %vm709_vm5 = vcmask 1044484   ;;  %vm711_vm6 = vcmask 1045509   ;;  %s1460_s8 = smov 4  }
  0x16   : > { %v159_v0 = vld [vmem:[%s150_s25] sm:$0xff]  ;;  %v161_v1 = vld [vmem:[%s150_s25 + $0x10] sm:$0xff]  ;;  %v160_v2 = vld [vmem:[%s150_s25 + $0x8] sm:$0xff]  ;;  %v1567_v24 = vunpack.c.0.s8 %v249_v20  ;;  %v1604_v55 = vunpack.c.0.s8 %v297_v40  ;;  %vm713_vm7 = vcmask 1046534   ;;  %vm715_vm8 = vcmask 1047559   ;;  %s2203_s14 = smul.u32 24, %s136_s7 }
  0x17   : > { %165 = vrot.lane.b32.xlu0 %v159_v0, %s1449_s26  ;;  %169 = vrot.lane.b32.xlu1 %v161_v1, %s1449_s26  ;;  %s1461_s16 = smov 6   ;;  %vm734_vm9 = vcmask 64512   ;;  %s1462_s23 = smov 8   ;;  %vm1161_vm10 = vcmask 31744   ;;  %vm1165_vm11 = vcmask 48128   ;;  %vm1172_vm12 = vcmask 80896  }
  0x18   : > { %s2249_s17 = scalar_lea.vmem [#allocation2], %s2203_s14  ;;  %s1463_s24 = smov 10   ;;  %vm1176_vm13 = vcmask 97280   ;;  %vm1180_vm14 = vcmask 113664  }
  0x19   : > { %s1464_s25 = smov 12  }
  0x1f   : > { %167 = vrot.lane.b32.xlu0 %v160_v2, %s1449_s26  ;;  %s1465_s26 = smov 14  }
  0x89   : > { %v166_v3 = vpop.permute.xlu0 %165  ;;  %v170_v7 = vpop.permute.xlu1 %169 }
  0x8a   : > { %v1540_v4 = vmax.f32 %v159_v0, %v166_v3  ;;  %v176_v8 = vmax.f32 %v161_v1, %v170_v7 }
  0x8c   : > { %189 = vrot.lane.b32.xlu0 %v1540_v4, %s1450_s27  ;;  %180 = vrot.lane.b32.xlu1 %v1540_v4, %s1451_s28  ;;  %v246_v23 = vrot.slane %v1540_v4, 4  ;;  %v470_v34 = vrot.slane %v176_v8, 4 }
  0x91   : > { %v168_v5 = vpop.permute.xlu0 %167 }
  0x92   : > { %v1544_v6 = vmax.f32 %v160_v2, %v168_v5 }
  0x94   : > { %198 = vrot.lane.b32.xlu0 %v1540_v4, %s1452_s29  ;;  %191 = vrot.lane.b32.xlu1 %v1544_v6, %s1450_s27  ;;  %v358_v43 = vrot.slane %v1544_v6, 4 }
  0x95   : > { %182 = vrot.lane.b32.xlu2 %v1544_v6, %s1451_s28 }
  0x9c   : > { %207 = vrot.lane.b32.xlu0 %v1540_v4, %s1453_s30  ;;  %200 = vrot.lane.b32.xlu1 %v1544_v6, %s1452_s29 }
  0x9d   : > { %184 = vrot.lane.b32.xlu2 %v176_v8, %s1451_s28  ;;  %s1325_s28 = smul.u32 24, %s1504_s13 }
  0xa4   : > { %225 = vrot.lane.b32.xlu0 %v1540_v4, %s1454_s3  ;;  %209 = vrot.lane.b32.xlu1 %v1544_v6, %s1453_s30 }
  0xa5   : > { %193 = vrot.lane.b32.xlu2 %v176_v8, %s1450_s27  ;;  %s1466_s27 = smov 16  }
  0xac   : > { %216 = vrot.lane.b32.xlu0 %v1540_v4, %s1455_s4  ;;  %227 = vrot.lane.b32.xlu1 %v1544_v6, %s1454_s3 }
  0xad   : > { %202 = vrot.lane.b32.xlu2 %v176_v8, %s1452_s29  ;;  %s1222_s29 = sshll.u32 %s2249_s17, 4  ;;  %s1223_s29 = int_to_ptr.vmem [resolvable:$true] %s1222_s29 }
  0xb4   : > { %234 = vrot.lane.b32.xlu0 %v1540_v4, %s1456_s5  ;;  %218 = vrot.lane.b32.xlu1 %v1544_v6, %s1455_s4 }
  0xb5   : > { %211 = vrot.lane.b32.xlu2 %v176_v8, %s1453_s30 }
  0xbc   : > { %236 = vrot.lane.b32.xlu1 %v1544_v6, %s1456_s5 }
  0xbd   : > { %229 = vrot.lane.b32.xlu2 %v176_v8, %s1454_s3 }
  0xc5   : > { %220 = vrot.lane.b32.xlu2 %v176_v8, %s1455_s4  ;;  %s1221_s4 = scalar_lea.hbm %s2365_s1, %s1325_s28 }
  0xcd   : > { %238 = vrot.lane.b32.xlu2 %v176_v8, %s1456_s5  ;;  %s1224_s5 = sshll.u32 %s1221_s4, 4  ;;  %s1225_s5 = int_to_ptr.hbm [resolvable:$true] %s1224_s5 }
  0xef   : > { %v1558_v9 = vpop.permute.xlu2 %182 }
  0xf0   : > { %v370_v52 = vrot.slane %v1558_v9, 4 }
  0xf7   : > { %v185_v10 = vpop.permute.xlu2 %184 }
  0xf8   : > { %v482_v45 = vrot.slane %v185_v10, 4 }
  0xfe   : > { %v181_v11 = vpop.permute.xlu1 %180  ;;  %v190_v12 = vpop.permute.xlu0 %189 }
  0xff   : > { %v194_v13 = vpop.permute.xlu2 %193  ;;  %v258_v26 = vrot.slane %v181_v11, 4  ;;  %v247_v27 = vsel %vm244_vm0, %v190_v12, %v246_v23  ;;  %v243_v29 = vrot.slane %v190_v12, 4 }
 0x100   : > { %v468_v25 = vrot.slane %v194_v13, 4  ;;  %v1578_v36 = vperm.slane %v247_v27, %v1567_v24  ;;  %v471_v41 = vsel %vm244_vm0, %v194_v13, %v470_v34 }
 0x101   : > { %v245_v47 = vsel %vm244_vm0, %v243_v29, %v1540_v4  ;;  %v1601_v53 = vperm.slane %v471_v41, %v1567_v24 }
 0x102   : > { %v469_v35 = vsel %vm244_vm0, %v468_v25, %v176_v8  ;;  %v306_v49 = vrot.slane %v1578_v36, 4  ;;  %v1607_v56 = vperm.slane %v245_v47, %v1567_v24 }
 0x103   : > { %v1591_v46 = vperm.slane %v469_v35, %v1567_v24  ;;  %v530_v8 = vrot.slane %v1601_v53, 4 }
 0x105   : > { %v518_v60 = vrot.slane %v1591_v46, 4 }
 0x106   : > { %v192_v14 = vpop.permute.xlu1 %191  ;;  %v199_v15 = vpop.permute.xlu0 %198 }
 0x107   : > { %v203_v16 = vpop.permute.xlu2 %202  ;;  %v256_v22 = vrot.slane %v199_v15, 4  ;;  %v259_v31 = vsel %vm244_vm0, %v199_v15, %v258_v26  ;;  %v356_v42 = vrot.slane %v192_v14, 4  ;;  %v359_v50 = vsel %vm244_vm0, %v192_v14, %v358_v43 }
 0x108   : > { %v480_v30 = vrot.slane %v203_v16, 4  ;;  %v1588_v44 = vperm.slane %v259_v31, %v1567_v24  ;;  %v483_v54 = vsel %vm244_vm0, %v203_v16, %v482_v45  ;;  %v1618_v61 = vperm.slane %v359_v50, %v1567_v24 }
 0x109   : > { %v257_v28 = vsel %vm244_vm0, %v256_v22, %v181_v11  ;;  %v357_v57 = vsel %vm244_vm0, %v356_v42, %v1544_v6  ;;  %v1623_v1 = vperm.slane %v483_v54, %v1567_v24 }
 0x10a   : > { %v1581_v37 = vperm.slane %v257_v28, %v1567_v24  ;;  %v481_v48 = vsel %vm244_vm0, %v480_v30, %v185_v10  ;;  %v307_v59 = vsel %vm244_vm0, %v1588_v44, %v306_v49  ;;  %v1630_v6 = vperm.slane %v357_v57, %v1567_v24 }
 0x10b   : > { %v1612_v58 = vperm.slane %v481_v48, %v1567_v24  ;;  %v1633_v7 = vperm.slane %v307_v59, %v1604_v55  ;;  %v418_v14 = vrot.slane %v1618_v61, 4  ;;  %v1649_v15 = vsel %vm244_vm0, %v1623_v1, %v530_v8 }
 0x10c   : > { %v292_v51 = vrot.slane %v1581_v37, 4  ;;  %v406_v19 = vrot.slane %v1630_v6, 4 }
 0x10d   : > { %v519_v12 = vsel %vm244_vm0, %v1612_v58, %v518_v60  ;;  %v354_v22 = vrot.slane %v1633_v7, 4 }
 0x10e   : > { %v1560_v17 = vpop.permute.xlu1 %200  ;;  %v1562_v18 = vpop.permute.xlu0 %207  ;;  %v293_v5 = vsel %vm244_vm0, %v292_v51, %v1607_v56  ;;  %v1660_v23 = vperm.slane %v519_v12, %v1604_v55 }
 0x10f   : > { %v1564_v21 = vpop.permute.xlu2 %211  ;;  %v371_v62 = vsel %vm244_vm0, %v1560_v17, %v370_v52  ;;  %v368_v2 = vrot.slane %v1560_v17, 4  ;;  %v270_v3 = vrot.slane %v1562_v18, 4  ;;  %v1644_v13 = vperm.slane %v293_v5, %v1604_v55 }
 0x110   : > { %v1637_v10 = vperm.slane %v371_v62, %v1567_v24  ;;  %v494_v26 = vrot.slane %v1564_v21, 4 }
 0x111   : > { %v369_v16 = vsel %vm244_vm0, %v368_v2, %v1558_v9  ;;  %v342_v34 = vrot.slane %v1644_v13, 4 }
 0x112   : > { %v419_v25 = vsel %vm244_vm0, %v1637_v10, %v418_v14  ;;  %v1667_v28 = vperm.slane %v369_v16, %v1567_v24 }
 0x113   : > { %v1679_v47 = vperm.slane %v419_v25, %v1604_v55 }
 0x114   : > { %v407_v60 = vsel %vm244_vm0, %v1667_v28, %v406_v19 }
 0x116   : > { %v1572_v32 = vpop.permute.xlu1 %209  ;;  %v1574_v33 = vpop.permute.xlu0 %225 }
 0x117   : > { %v1583_v38 = vpop.permute.xlu2 %229  ;;  %v271_v11 = vsel %vm244_vm0, %v1574_v33, %v270_v3  ;;  %v268_v27 = vrot.slane %v1574_v33, 4  ;;  %v382_v29 = vrot.slane %v1572_v32, 4 }
 0x118   : > { %v492_v17 = vrot.slane %v1583_v38, 4  ;;  %v1656_v20 = vperm.slane %v271_v11, %v1567_v24  ;;  %v495_v48 = vsel %vm244_vm0, %v1583_v38, %v494_v26  ;;  %v466_v26 = vrot.slane %v1679_v47, 4 }
 0x119   : > { %v1709_v3 = vperm.slane %v495_v48, %v1567_v24 }
 0x11a   : > { %v493_v35 = vsel %vm244_vm0, %v492_v17, %v1564_v21  ;;  %v330_v33 = vrot.slane %v1656_v20, 4  ;;  %v269_v21 = vsel %vm244_vm0, %v268_v27, %v1562_v18 }
 0x11b   : > { %v1688_v51 = vperm.slane %v493_v35, %v1567_v24  ;;  %v275_v62 = vperm.slane %v269_v21, %v1567_v24 }
 0x11d   : > { %v542_v8 = vrot.slane %v1688_v51, 4 }
 0x11e   : > { %v228_v63 = vpop.permute.xlu1 %227  ;;  %v217_v0 = vpop.permute.xlu0 %216 }
 0x11f   : > { %v221_v4 = vpop.permute.xlu2 %220  ;;  %v282_v9 = vrot.slane %v217_v0, 4  ;;  %v380_v39 = vrot.slane %v228_v63, 4  ;;  %v383_v49 = vsel %vm244_vm0, %v228_v63, %v382_v29 }
 0x120   : > { %v506_v59 = vrot.slane %v221_v4, 4  ;;  %v1703_v63 = vperm.slane %v383_v49, %v1567_v24 }
 0x121   : > { %v381_v38 = vsel %vm244_vm0, %v380_v39, %v1572_v32 }
 0x122   : > { %v1716_v11 = vperm.slane %v381_v38, %v1567_v24  ;;  %v570_v38 = vrot.slane %v1660_v23, 4 }
 0x126   : > { %v219_v30 = vpop.permute.xlu1 %218  ;;  %v235_v31 = vpop.permute.xlu0 %234 }
 0x127   : > { %v239_v40 = vpop.permute.xlu2 %238  ;;  %v280_v41 = vrot.slane %v235_v31, 4  ;;  %v283_v42 = vsel %vm244_vm0, %v235_v31, %v282_v9  ;;  %v394_v32 = vrot.slane %v219_v30, 4  ;;  %v554_v31 = vrot.slane %v1709_v3, 4 }
 0x128   : > { %v504_v43 = vrot.slane %v239_v40, 4  ;;  %v1676_v45 = vperm.slane %v283_v42, %v1567_v24 }
 0x129   : > { %v281_v50 = vsel %vm244_vm0, %v280_v41, %v217_v0  ;;  %v430_v41 = vrot.slane %v1716_v11, 4 }
 0x12a   : > { %v505_v52 = vsel %vm244_vm0, %v504_v43, %v221_v4  ;;  %v287_v54 = vperm.slane %v281_v50, %v1567_v24  ;;  %v331_v57 = vsel %vm244_vm0, %v1676_v45, %v330_v33  ;;  %v507_v4 = vsel %vm244_vm0, %v239_v40, %v506_v59 }
 0x12b   : > { %v1697_v18 = vperm.slane %v331_v57, %v1604_v55  ;;  %v1706_v0 = vperm.slane %v505_v52, %v1567_v24  ;;  %v1725_v27 = vperm.slane %v507_v4, %v1567_v24  ;;  %v539_v59 = vperm.slane %v1649_v15, %v1604_v55 }
 0x12c   : > { %v316_v2 = vrot.slane %v287_v54, 4 }
 0x12d   : > { %v355_v5 = vsel %vm244_vm0, %v1697_v18, %v354_v22  ;;  %v442_v22 = vrot.slane %v1703_v63, 4  ;;  %v543_v29 = vsel %vm244_vm0, %v1706_v0, %v542_v8  ;;  %v555_v52 = vsel %vm244_vm0, %v1725_v27, %v554_v31 }
 0x12e   : > { %v237_v12 = vpop.permute.xlu1 %236  ;;  %v602_v14 = vsel %vm580_vm1, %v355_v5, -inf  ;;  %v317_v16 = vsel %vm244_vm0, %v316_v2, %v275_v62  ;;  %v318_v2 = vrot.slane %v275_v62, 4  ;;  %v563_v5 = vperm.slane %v555_v52, %v1604_v55 }
 0x12f   : > { %v392_v17 = vrot.slane %v237_v12, 4  ;;  %v395_v19 = vsel %vm244_vm0, %v237_v12, %v394_v32  ;;  %603 = vmax.xlane.f32.xlu2 %v602_v14  ;;  %v323_v25 = vperm.slane %v317_v16, %v1604_v55  ;;  %v578_v14 = vrot.slane %v539_v59, 4 }
 0x130   : > { %v1728_v9 = vperm.slane %v395_v19, %v1567_v24  ;;  %v319_v8 = vsel %vm244_vm0, %v287_v54, %v318_v2  ;;  %v576_v62 = vrot.slane %v563_v5, 4  ;;  %v294_v19 = vrot.slane %v1607_v56, 4 }
 0x131   : > { %v393_v35 = vsel %vm244_vm0, %v392_v17, %v219_v30  ;;  %v343_v39 = vsel %vm244_vm0, %v323_v25, %v342_v34  ;;  %v340_v40 = vrot.slane %v323_v25, 4  ;;  %v1744_v30 = vperm.slane %v543_v29, %v1604_v55 }
 0x132   : > { %v399_v42 = vperm.slane %v393_v35, %v1567_v24  ;;  %v584_v33 = vsel %vm580_vm1, %v343_v39, -inf  ;;  %v443_v43 = vsel %vm244_vm0, %v1728_v9, %v442_v22  ;;  %v415_v34 = vperm.slane %v407_v60, %v1604_v55 }
 0x133   : > { %585 = vmax.xlane.f32.xlu1 %v584_v33  ;;  %v341_v48 = vsel %vm244_vm0, %v340_v40, %v1644_v13  ;;  %v451_v21 = vperm.slane %v443_v43, %v1604_v55  ;;  %v571_v32 = vsel %vm244_vm0, %v1744_v30, %v570_v38  ;;  %v579_v15 = vsel %vm244_vm0, %v563_v5, %v578_v14 }
 0x134   : > { %v581_v49 = vsel %vm580_vm1, %v341_v48, -inf  ;;  %v431_v50 = vsel %vm244_vm0, %v399_v42, %v430_v41  ;;  %v458_v4 = vrot.slane %v415_v34, 4  ;;  %v638_v16 = vsel %vm580_vm1, %v571_v32, -inf }
 0x135   : > { %582 = vmax.xlane.f32.xlu0 %v581_v49  ;;  %v467_v57 = vsel %vm244_vm0, %v451_v21, %v466_v26  ;;  %v439_v13 = vperm.slane %v431_v50, %v1604_v55  ;;  %v327_v17 = vperm.slane %v319_v8, %v1604_v55  ;;  %v404_v25 = vrot.slane %v1667_v28, 4 }
 0x136   : > { %v626_v60 = vsel %vm580_vm1, %v467_v57, -inf  ;;  %v464_v22 = vrot.slane %v451_v21, 4  ;;  %v428_v54 = vrot.slane %v399_v42, 4  ;;  %v650_v29 = vsel %vm580_vm1, %v579_v15, -inf }
 0x137   : > { %627 = vmax.xlane.f32.xlu2 %v626_v60  ;;  %v459_v12 = vsel %vm244_vm0, %v439_v13, %v458_v4  ;;  %v295_v31 = vsel %vm244_vm0, %v1581_v37, %v294_v19  ;;  %v577_v35 = vsel %vm244_vm0, %v576_v62, %v539_v59  ;;  %v344_v39 = vrot.slane %v327_v17, 4 }
 0x138   : > { %v614_v26 = vsel %vm580_vm1, %v459_v12, -inf  ;;  %v405_v40 = vsel %vm244_vm0, %v404_v25, %v1630_v6  ;;  %v465_v56 = vsel %vm244_vm0, %v464_v22, %v1679_v47  ;;  %v303_v28 = vperm.slane %v295_v31, %v1604_v55 }
 0x139   : > { %v647_v41 = vsel %vm580_vm1, %v577_v35, -inf  ;;  %v429_v42 = vsel %vm244_vm0, %v428_v54, %v1716_v11  ;;  %v456_v33 = vrot.slane %v439_v13, 4  ;;  %v1782_v43 = vperm.slane %v405_v40, %v1604_v55 }
 0x13a   : > { %v345_v37 = vsel %vm244_vm0, %v344_v39, %v303_v28  ;;  %v516_v48 = vrot.slane %v1612_v58, 4  ;;  %v623_v6 = vsel %vm580_vm1, %v465_v56, -inf  ;;  %v1787_v47 = vperm.slane %v429_v42, %v1604_v55 }
 0x13b   : > { %639 = vmax.xlane.f32.xlu1 %v638_v16  ;;  %v540_v21 = vrot.slane %v1706_v0, 4  ;;  %v587_v49 = vsel %vm580_vm1, %v345_v37, -inf  ;;  %v457_v11 = vsel %vm244_vm0, %v456_v33, %v415_v34  ;;  %v454_v50 = vrot.slane %v1782_v43, 4 }
 0x13c   : > { %v517_v52 = vsel %vm244_vm0, %v516_v48, %v1591_v46  ;;  %v346_v57 = vrot.slane %v303_v28, 4  ;;  %v304_v38 = vrot.slane %v1588_v44, 4  ;;  %v328_v13 = vrot.slane %v1676_v45, 4 }
 0x13d   : > { %615 = vmax.xlane.f32.xlu0 %v614_v26  ;;  %v455_v58 = vsel %vm244_vm0, %v1787_v47, %v454_v50  ;;  %v611_v0 = vsel %vm580_vm1, %v457_v11, -inf  ;;  %v541_v59 = vsel %vm244_vm0, %v540_v21, %v1688_v51  ;;  %v568_v2 = vrot.slane %v1744_v30, 4 }
 0x13e   : > { %v347_v34 = vsel %vm244_vm0, %v327_v17, %v346_v57  ;;  %v523_v46 = vperm.slane %v517_v52, %v1604_v55  ;;  %v440_v60 = vrot.slane %v1728_v9, 4  ;;  %v608_v32 = vsel %vm580_vm1, %v455_v58, -inf }
 0x13f   : > { %651 = vmax.xlane.f32.xlu2 %v650_v29  ;;  %v547_v44 = vperm.slane %v541_v59, %v1604_v55  ;;  %v590_v45 = vsel %vm580_vm1, %v347_v34, -inf  ;;  %v305_v4 = vsel %vm244_vm0, %v304_v38, %v1578_v36  ;;  %v329_v51 = vsel %vm244_vm0, %v328_v13, %v1656_v20 }
 0x140   : > { %v569_v30 = vsel %vm244_vm0, %v568_v2, %v1660_v23  ;;  %v566_v5 = vrot.slane %v523_v46, 4  ;;  %v352_v9 = vrot.slane %v1697_v18, 4  ;;  %v552_v8 = vrot.slane %v1725_v27, 4 }
 0x141   : > { %v441_v12 = vsel %vm244_vm0, %v440_v60, %v1703_v63  ;;  %v311_v16 = vperm.slane %v305_v4, %v1604_v55  ;;  %v335_v36 = vperm.slane %v329_v51, %v1604_v55  ;;  %v416_v20 = vrot.slane %v1637_v10, 4 }
 0x142   : > { %v567_v14 = vsel %vm244_vm0, %v547_v44, %v566_v5  ;;  %v635_v15 = vsel %vm580_vm1, %v569_v30, -inf  ;;  %v353_v23 = vsel %vm244_vm0, %v352_v9, %v1633_v7  ;;  %v447_v18 = vperm.slane %v441_v12, %v1604_v55 }
 0x143   : > { %648 = vmax.xlane.f32.xlu1 %v647_v41  ;;  %v632_v27 = vsel %vm580_vm1, %v567_v14, -inf  ;;  %v553_v63 = vsel %vm244_vm0, %v552_v8, %v1709_v3  ;;  %v350_v62 = vrot.slane %v311_v16, 4  ;;  %v348_v17 = vrot.slane %v335_v36, 4 }
 0x144   : > { %v528_v19 = vrot.slane %v1623_v1, 4  ;;  %v599_v10 = vsel %vm580_vm1, %v353_v23, -inf  ;;  %v417_v25 = vsel %vm244_vm0, %v416_v20, %v1618_v61  ;;  %v460_v26 = vrot.slane %v447_v18, 4 }
 0x145   : > { %624 = vmax.xlane.f32.xlu0 %v623_v6  ;;  %v351_v7 = vsel %vm244_vm0, %v335_v36, %v350_v62  ;;  %v559_v22 = vperm.slane %v553_v63, %v1604_v55  ;;  %v349_v54 = vsel %vm244_vm0, %v348_v17, %v311_v16  ;;  %v423_v3 = vperm.slane %v417_v25, %v1604_v55 }
 0x146   : > { %v596_v29 = vsel %vm580_vm1, %v351_v7, -inf  ;;  %v529_v1 = vsel %vm244_vm0, %v528_v19, %v1601_v53  ;;  %v593_v61 = vsel %vm580_vm1, %v349_v54, -inf  ;;  %v564_v33 = vrot.slane %v547_v44, 4 }
 0x147   : > { %588 = vmax.xlane.f32.xlu2 %v587_v49  ;;  %v461_v31 = vsel %vm244_vm0, %v460_v26, %v423_v3  ;;  %v572_v35 = vrot.slane %v559_v22, 4  ;;  %v535_v39 = vperm.slane %v529_v1, %v1604_v55  ;;  %v462_v28 = vrot.slane %v423_v3, 4 }
 0x148   : > { %v617_v40 = vsel %vm580_vm1, %v461_v31, -inf  ;;  %v452_v6 = vrot.slane %v1787_v47, 4  ;;  %v565_v49 = vsel %vm244_vm0, %v564_v33, %v523_v46  ;;  %v677_v57 = vlaneseq }
 0x149   : > { %v573_v56 = vsel %vm244_vm0, %v572_v35, %v535_v39  ;;  %v463_v41 = vsel %vm244_vm0, %v447_v18, %v462_v28  ;;  %v574_v42 = vrot.slane %v535_v39, 4  ;;  %v629_v50 = vsel %vm580_vm1, %v565_v49, -inf }
 0x14a   : > { %v641_v53 = vsel %vm580_vm1, %v573_v56, -inf  ;;  %v620_v48 = vsel %vm580_vm1, %v463_v41, -inf  ;;  %v453_v11 = vsel %vm244_vm0, %v452_v6, %v1782_v43  ;;  %v1859_v13 = vand.u32 127, %v677_v57 }
 0x14b   : > { %612 = vmax.xlane.f32.xlu1 %v611_v0  ;;  %v575_v37 = vsel %vm244_vm0, %v559_v22, %v574_v42  ;;  %v605_v52 = vsel %vm580_vm1, %v453_v11, -inf }
 0x14c   : > { %v644_v21 = vsel %vm580_vm1, %v575_v37, -inf }
 0x14d   : > { %609 = vmax.xlane.f32.xlu0 %v608_v32 }
 0x14f   : > { %591 = vmax.xlane.f32.xlu2 %v590_v45 }
 0x153   : > { %636 = vmax.xlane.f32.xlu1 %v635_v15 }
 0x155   : > { %633 = vmax.xlane.f32.xlu0 %v632_v27 }
 0x157   : > { %600 = vmax.xlane.f32.xlu2 %v599_v10 }
 0x15b   : > { %597 = vmax.xlane.f32.xlu1 %v596_v29 }
 0x15d   : > { %594 = vmax.xlane.f32.xlu0 %v593_v61 }
 0x15f   : > { %618 = vmax.xlane.f32.xlu2 %v617_v40 }
 0x163   : > { %642 = vmax.xlane.f32.xlu1 %v641_v53 }
 0x165   : > { %621 = vmax.xlane.f32.xlu0 %v620_v48 }
 0x167   : > { %645 = vmax.xlane.f32.xlu2 %v644_v21 }
 0x16b   : > { %630 = vmax.xlane.f32.xlu1 %v629_v50 }
 0x16d   : > { %606 = vmax.xlane.f32.xlu0 %v605_v52 }
 0x1a2   : > { %v1857_v58 = vpop.xlane.xlu2 %603 }
 0x1a3   : > { %v686_v9 = vperm.slane %v1857_v58, %v1859_v13  ;;  %v774_v14 = vrot.slane %v1857_v58, 4 }
 0x1a6   : > { %v586_v38 = vpop.xlane.xlu1 %585 }
 0x1a7   : > { %v680_v0 = vperm.slane %v586_v38, %v1859_v13  ;;  %v752_v16 = vrot.slane %v586_v38, 4 }
 0x1a8   : > { %v583_v47 = vpop.xlane.xlu0 %582 }
 0x1a9   : > { %v679_v59 = vperm.slane %v583_v47, %v1859_v13  ;;  %v740_v4 = vrot.slane %v583_v47, 4 }
 0x1aa   : > { %v1863_v34 = vpop.xlane.xlu2 %627 }
 0x1ab   : > { %v704_v43 = vsel %vm703_vm2, %v680_v0, %v679_v59  ;;  %v886_v20 = vrot.slane %v1863_v34, 4 }
 0x1ae   : > { %v1866_v2 = vpop.xlane.xlu1 %639 }
 0x1af   : > { %v698_v63 = vperm.slane %v1866_v2, %v1859_v13  ;;  %v974_v62 = vrot.slane %v1866_v2, 4 }
 0x1b0   : > { %v1868_v46 = vpop.xlane.xlu0 %615 }
 0x1b1   : > { %v862_v15 = vrot.slane %v1868_v46, 4  ;;  %v690_v10 = vperm.slane %v1868_v46, %v1859_v13 }
 0x1b2   : > { %v1870_v60 = vpop.xlane.xlu2 %651 }
 0x1b3   : > { %v998_v40 = vrot.slane %v1870_v60, 4 }
 0x1b6   : > { %v1872_v32 = vpop.xlane.xlu1 %648 }
 0x1b7   : > { %v701_v56 = vperm.slane %v1872_v32, %v1859_v13  ;;  %v986_v28 = vrot.slane %v1872_v32, 4 }
 0x1b8   : > { %v1874_v44 = vpop.xlane.xlu0 %624 }
 0x1b9   : > { %v693_v42 = vperm.slane %v1874_v44, %v1859_v13  ;;  %v874_v50 = vrot.slane %v1874_v44, 4 }
 0x1ba   : > { %v589_v45 = vpop.xlane.xlu2 %588 }
 0x1bb   : > { %v741_v51 = vsel %vm244_vm0, %v589_v45, %v740_v4  ;;  %v738_v30 = vrot.slane %v589_v45, 4  ;;  %v681_v54 = vperm.slane %v589_v45, %v1859_v13 }
 0x1bc   : > { %v749_v8 = vperm.slane %v741_v51, %v1567_v24 }
 0x1bd   : > { %v739_v23 = vsel %vm244_vm0, %v738_v30, %v583_v47  ;;  %v706_v52 = vsel %vm705_vm3, %v681_v54, %v704_v43 }
 0x1be   : > { %v1877_v5 = vpop.xlane.xlu1 %612  ;;  %v800_v25 = vrot.slane %v749_v8, 4  ;;  %v745_v3 = vperm.slane %v739_v23, %v1567_v24 }
 0x1bf   : > { %v689_v57 = vperm.slane %v1877_v5, %v1859_v13  ;;  %v850_v0 = vrot.slane %v1877_v5, 4 }
 0x1c0   : > { %v1882_v12 = vpop.xlane.xlu0 %609  ;;  %v788_v6 = vrot.slane %v745_v3, 4 }
 0x1c1   : > { %v864_v18 = vrot.slane %v1882_v12, 4  ;;  %v863_v7 = vsel %vm244_vm0, %v862_v15, %v1882_v12  ;;  %v688_v59 = vperm.slane %v1882_v12, %v1859_v13 }
 0x1c2   : > { %v592_v27 = vpop.xlane.xlu2 %591  ;;  %v1916_v41 = vperm.slane %v863_v7, %v1567_v24 }
 0x1c3   : > { %v750_v17 = vrot.slane %v592_v27, 4  ;;  %v753_v19 = vsel %vm244_vm0, %v592_v27, %v752_v16  ;;  %v865_v1 = vsel %vm244_vm0, %v1868_v46, %v864_v18  ;;  %v682_v53 = vperm.slane %v592_v27, %v1859_v13 }
 0x1c4   : > { %v761_v26 = vperm.slane %v753_v19, %v1567_v24  ;;  %v1925_v21 = vperm.slane %v865_v1, %v1567_v24  ;;  %v898_v45 = vrot.slane %v1916_v41, 4 }
 0x1c5   : > { %v751_v29 = vsel %vm244_vm0, %v750_v17, %v586_v38  ;;  %v708_v43 = vsel %vm707_vm4, %v682_v53, %v706_v52 }
 0x1c6   : > { %v757_v31 = vperm.slane %v751_v29, %v1567_v24  ;;  %v798_v35 = vrot.slane %v761_v26, 4  ;;  %v1908_v61 = vpop.xlane.xlu1 %636  ;;  %v801_v39 = vsel %vm244_vm0, %v761_v26, %v800_v25 }
 0x1c7   : > { %v1935_v47 = vperm.slane %v801_v39, %v1604_v55  ;;  %v697_v15 = vperm.slane %v1908_v61, %v1859_v13  ;;  %v962_v23 = vrot.slane %v1908_v61, 4 }
 0x1c8   : > { %v786_v37 = vrot.slane %v757_v31, 4  ;;  %v1921_v33 = vpop.xlane.xlu0 %633  ;;  %v799_v48 = vsel %vm244_vm0, %v798_v35, %v749_v8  ;;  %v789_v4 = vsel %vm244_vm0, %v757_v31, %v788_v6 }
 0x1c9   : > { %v975_v49 = vsel %vm244_vm0, %v974_v62, %v1921_v33  ;;  %v976_v11 = vrot.slane %v1921_v33, 4  ;;  %v1948_v8 = vperm.slane %v799_v48, %v1604_v55  ;;  %v696_v27 = vperm.slane %v1921_v33, %v1859_v13 }
 0x1ca   : > { %v601_v38 = vpop.xlane.xlu2 %600  ;;  %v1944_v51 = vperm.slane %v975_v49, %v1567_v24  ;;  %v787_v30 = vsel %vm244_vm0, %v786_v37, %v745_v3  ;;  %v1960_v19 = vperm.slane %v789_v4, %v1604_v55 }
 0x1cb   : > { %v977_v18 = vsel %vm244_vm0, %v1866_v2, %v976_v11  ;;  %v685_v62 = vperm.slane %v601_v38, %v1859_v13  ;;  %v762_v7 = vrot.slane %v601_v38, 4  ;;  %v1967_v3 = vperm.slane %v787_v30, %v1604_v55 }
 0x1cc   : > { %v1970_v29 = vperm.slane %v977_v18, %v1567_v24  ;;  %v1010_v1 = vrot.slane %v1944_v51, 4 }
 0x1ce   : > { %v598_v17 = vpop.xlane.xlu1 %597 }
 0x1cf   : > { %v775_v26 = vsel %vm244_vm0, %v774_v14, %v598_v17  ;;  %v776_v54 = vrot.slane %v598_v17, 4  ;;  %v684_v6 = vperm.slane %v598_v17, %v1859_v13 }
 0x1d0   : > { %v781_v31 = vperm.slane %v775_v26, %v1567_v24  ;;  %v595_v35 = vpop.xlane.xlu0 %594 }
 0x1d1   : > { %v777_v53 = vsel %vm244_vm0, %v1857_v58, %v776_v54  ;;  %v683_v37 = vperm.slane %v595_v35, %v1859_v13  ;;  %v763_v14 = vsel %vm244_vm0, %v762_v7, %v595_v35  ;;  %v764_v48 = vrot.slane %v595_v35, 4 }
 0x1d2   : > { %v1981_v49 = vperm.slane %v777_v53, %v1567_v24  ;;  %v810_v11 = vrot.slane %v781_v31, 4  ;;  %v769_v52 = vperm.slane %v763_v14, %v1567_v24  ;;  %v1984_v4 = vpop.xlane.xlu2 %618  ;;  %v836_v7 = vrot.slane %v1967_v3, 4 }
 0x1d3   : > { %v710_v30 = vsel %vm709_vm5, %v683_v37, %v708_v43  ;;  %v765_v18 = vsel %vm244_vm0, %v601_v38, %v764_v48  ;;  %v875_v26 = vsel %vm244_vm0, %v874_v50, %v1984_v4  ;;  %v876_v22 = vrot.slane %v1984_v4, 4 }
 0x1d4   : > { %v712_v17 = vsel %vm711_vm6, %v684_v6, %v710_v30  ;;  %v1994_v35 = vperm.slane %v765_v18, %v1567_v24  ;;  %v812_v53 = vrot.slane %v769_v52, 4  ;;  %v881_v43 = vperm.slane %v875_v26, %v1567_v24 }
 0x1d5   : > { %v714_v14 = vsel %vm713_vm7, %v685_v62, %v712_v17  ;;  %v811_v38 = vsel %vm244_vm0, %v810_v11, %v769_v52  ;;  %v822_v50 = vrot.slane %v1981_v49, 4  ;;  %v691_v48 = vperm.slane %v1984_v4, %v1859_v13 }
 0x1d6   : > { %v2005_v37 = vsel %vm715_vm8, %v686_v9, %v714_v14  ;;  %v643_v6 = vpop.xlane.xlu1 %642  ;;  %v2010_v62 = vperm.slane %v811_v38, %v1604_v55  ;;  %v877_v11 = vsel %vm244_vm0, %v1874_v44, %v876_v22  ;;  %v813_v58 = vsel %vm244_vm0, %v781_v31, %v812_v53 }
 0x1d7   : > { %v987_v52 = vsel %vm244_vm0, %v986_v28, %v643_v6  ;;  %v2020_v9 = vperm.slane %v877_v11, %v1567_v24  ;;  %v924_v18 = vrot.slane %v881_v43, 4  ;;  %v988_v26 = vrot.slane %v643_v6, 4  ;;  %735 = vst.msk [vmem:[%s2249_s17] sm:$0xff] %vm734_vm9, %v2005_v37 }
 0x1d8   : > { %v837_v17 = vsel %vm244_vm0, %v2010_v62, %v836_v7  ;;  %v2024_v14 = vpop.xlane.xlu0 %621  ;;  %v699_v38 = vperm.slane %v643_v6, %v1859_v13  ;;  %v2028_v22 = vperm.slane %v987_v52, %v1567_v24 }
 0x1d9   : > { %1077 = vrot.lane.b32.xlu2 %v837_v17, %s1459_s6  ;;  %v887_v28 = vsel %vm244_vm0, %v886_v20, %v2024_v14  ;;  %v888_v31 = vrot.slane %v2024_v14, 4  ;;  %v989_v7 = vsel %vm244_vm0, %v1872_v32, %v988_v26  ;;  %v692_v6 = vperm.slane %v2024_v14, %v1859_v13 }
 0x1da   : > { %v893_v11 = vperm.slane %v887_v28, %v1567_v24  ;;  %v646_v52 = vpop.xlane.xlu2 %645  ;;  %v2044_v36 = vperm.slane %v989_v7, %v1567_v24  ;;  %v1036_v30 = vrot.slane %v2028_v22, 4 }
 0x1db   : > { %v889_v20 = vsel %vm244_vm0, %v1863_v34, %v888_v31  ;;  %v999_v26 = vsel %vm244_vm0, %v998_v40, %v646_v52  ;;  %v1000_v28 = vrot.slane %v646_v52, 4  ;;  %v700_v39 = vperm.slane %v646_v52, %v1859_v13 }
 0x1dc   : > { %v2052_v25 = vperm.slane %v889_v20, %v1567_v24  ;;  %v922_v53 = vrot.slane %v893_v11, 4  ;;  %v925_v14 = vsel %vm244_vm0, %v893_v11, %v924_v18  ;;  %v1005_v7 = vperm.slane %v999_v26, %v1567_v24 }
 0x1dd   : > { %v2059_v17 = vperm.slane %v925_v14, %v1604_v55  ;;  %v1001_v20 = vsel %vm244_vm0, %v1870_v60, %v1000_v28  ;;  %v2066_v18 = vperm.slane %v813_v58, %v1604_v55  ;;  %v2075_v14 = vsel %vm244_vm0, %v822_v50, %v1994_v35 }
 0x1de   : > { %v631_v54 = vpop.xlane.xlu1 %630  ;;  %v2069_v11 = vperm.slane %v1001_v20, %v1567_v24  ;;  %v923_v26 = vsel %vm244_vm0, %v922_v53, %v881_v43  ;;  %v1034_v31 = vrot.slane %v1005_v7, 4  ;;  %v1037_v40 = vsel %vm244_vm0, %v1005_v7, %v1036_v30 }
 0x1df   : > { %v695_v52 = vperm.slane %v631_v54, %v1859_v13  ;;  %v963_v28 = vsel %vm244_vm0, %v962_v23, %v631_v54  ;;  %v964_v58 = vrot.slane %v631_v54, 4  ;;  %v950_v50 = vrot.slane %v2059_v17, 4 }
 0x1e0   : > { %v607_v16 = vpop.xlane.xlu0 %606  ;;  %v969_v43 = vperm.slane %v963_v28, %v1567_v24  ;;  %v1035_v46 = vsel %vm244_vm0, %v1034_v31, %v2028_v22  ;;  %v2169_v31 = vperm.slane %v1037_v40, %v1604_v55  ;;  %v838_v40 = vrot.slane %v2066_v18, 4 }
 0x1e1   : > { %v724_v20 = vsel %vm703_vm2, %v696_v27, %v695_v52  ;;  %v687_v53 = vperm.slane %v607_v16, %v1859_v13  ;;  %v965_v23 = vsel %vm244_vm0, %v1908_v61, %v964_v58  ;;  %v851_v33 = vsel %vm244_vm0, %v850_v0, %v607_v16 }
 0x1e2   : > { %v725_v30 = vsel %vm705_vm3, %v697_v15, %v724_v20  ;;  %v852_v54 = vrot.slane %v607_v16, 4  ;;  %v2102_v7 = vperm.slane %v965_v23, %v1567_v24  ;;  %v1011_v15 = vsel %vm244_vm0, %v1010_v1, %v969_v43 }
 0x1e3   : > { %v726_v27 = vsel %vm707_vm4, %v698_v63, %v725_v30  ;;  %v2108_v52 = vperm.slane %v923_v26, %v1604_v55  ;;  %v717_v0 = vsel %vm703_vm2, %v688_v59, %v687_v53  ;;  %v857_v63 = vperm.slane %v851_v33, %v1567_v24 }
 0x1e4   : > { %v727_v61 = vsel %vm709_vm5, %v699_v38, %v726_v27  ;;  %v853_v2 = vsel %vm244_vm0, %v1877_v5, %v852_v54  ;;  %v1046_v16 = vrot.slane %v2069_v11, 4  ;;  %v718_v1 = vsel %vm705_vm3, %v689_v57, %v717_v0 }
 0x1e5   : > { %v728_v28 = vsel %vm711_vm6, %v700_v39, %v727_v61  ;;  %v861_v38 = vperm.slane %v853_v2, %v1567_v24  ;;  %v1012_v26 = vrot.slane %v969_v43, 4  ;;  %v719_v12 = vsel %vm707_vm4, %v690_v10, %v718_v1 }
 0x1e6   : > { %v899_v59 = vsel %vm244_vm0, %v898_v45, %v857_v63  ;;  %v900_v58 = vrot.slane %v857_v63, 4  ;;  %v1024_v39 = vrot.slane %v2102_v7, 4  ;;  %v720_v5 = vsel %vm709_vm5, %v691_v48, %v719_v12 }
 0x1e7   : > { %v2138_v24 = vperm.slane %v1011_v15, %v1604_v55  ;;  %v2146_v10 = vsel %vm713_vm7, %v701_v56, %v728_v28  ;;  %v721_v57 = vsel %vm711_vm6, %v692_v6, %v720_v5  ;;  %v2152_v4 = vperm.slane %v899_v59, %v1604_v55 }
 0x1e8   : > { %v901_v45 = vsel %vm244_vm0, %v1916_v41, %v900_v58  ;;  %v912_v48 = vrot.slane %v861_v38, 4  ;;  %v2155_v20 = vperm.slane %v1035_v46, %v1604_v55  ;;  %v2163_v56 = vsel %vm713_vm7, %v693_v42, %v721_v57 }
 0x1e9   : > { %v1060_v22 = vrot.slane %v2138_v24, 4  ;;  %v909_v32 = vperm.slane %v901_v45, %v1604_v55  ;;  %v948_v6 = vrot.slane %v2152_v4, 4  ;;  %v1013_v41 = vsel %vm244_vm0, %v1944_v51, %v1012_v26 }
 0x1ea   : > { %v2175_v30 = vperm.slane %v1013_v41, %v1604_v55  ;;  %v1062_v51 = vrot.slane %v2169_v31, 4  ;;  %v1058_v33 = vrot.slane %v2155_v20, 4  ;;  %v946_v54 = vrot.slane %v2108_v52, 4 }
 0x1eb   : > { %v1061_v43 = vsel %vm244_vm0, %v2155_v20, %v1060_v22  ;;  %v951_v53 = vsel %vm244_vm0, %v950_v50, %v909_v32  ;;  %v952_v44 = vrot.slane %v909_v32, 4  ;;  %v949_v42 = vsel %vm244_vm0, %v2108_v52, %v948_v6 }
 0x1ec   : > { %1081 = vrot.lane.b32.xlu1 %v1061_v43, %s1459_s6  ;;  %1091 = vrot.lane.b32.xlu2 %v951_v53, %s1460_s8  ;;  %v2369_v50 = vrot.slane %v1925_v21, 4  ;;  %v2370_v15 = vrot.slane %v2052_v25, 4  ;;  %v1063_v0 = vsel %vm244_vm0, %v1062_v51, %v2175_v30  ;;  %v1064_v63 = vrot.slane %v2175_v30, 4 }
 0x1ed   : > { %1079 = vrot.lane.b32.xlu0 %v949_v42, %s1459_s6  ;;  %v953_v2 = vsel %vm244_vm0, %v2059_v17, %v952_v44  ;;  %v839_v52 = vsel %vm244_vm0, %v838_v40, %v1960_v19  ;;  %v2371_v1 = vrot.slane %v1970_v29, 4  ;;  %v1047_v26 = vsel %vm244_vm0, %v1046_v16, %v2044_v36  ;;  %s1205_s6 = scalar_lea.sflag [#allocation3], %s136_s7 }
 0x1ee   : > { %v911_v23 = vsel %vm244_vm0, %v2369_v50, %v861_v38  ;;  %v935_v61 = vsel %vm244_vm0, %v2370_v15, %v2020_v9  ;;  %v1053_v58 = vperm.slane %v1047_v26, %v1604_v55  ;;  %v829_v5 = vperm.slane %v2075_v14, %v1604_v55 }
 0x1ef   : > { %v917_v27 = vperm.slane %v911_v23, %v1604_v55  ;;  %v941_v28 = vperm.slane %v935_v61, %v1604_v55  ;;  %v1023_v38 = vsel %vm244_vm0, %v2371_v1, %v2102_v7  ;;  %v913_v57 = vsel %vm244_vm0, %v1925_v21, %v912_v48 }
 0x1f0   : > { %v1029_v59 = vperm.slane %v1023_v38, %v1604_v55  ;;  %v2372_v45 = vrot.slane %v2020_v9, 4  ;;  %v1025_v16 = vsel %vm244_vm0, %v1970_v29, %v1024_v39  ;;  %v1066_v22 = vrot.slane %v1053_v58, 4 }
 0x1f1   : > { %v956_v12 = vrot.slane %v917_v27, 4  ;;  %v954_v17 = vrot.slane %v941_v28, 4  ;;  %v842_v32 = vrot.slane %v829_v5, 4  ;;  %v921_v14 = vperm.slane %v913_v57, %v1604_v55 }
 0x1f2   : > { %v937_v7 = vsel %vm244_vm0, %v2052_v25, %v2372_v45  ;;  %v1068_v6 = vrot.slane %v1029_v59, 4  ;;  %v2373_v21 = vrot.slane %v1948_v8, 4  ;;  %v1033_v48 = vperm.slane %v1025_v16, %v1604_v55 }
 0x1f3   : > { %v957_v46 = vsel %vm244_vm0, %v941_v28, %v956_v12  ;;  %v955_v20 = vsel %vm244_vm0, %v954_v17, %v917_v27  ;;  %v945_v41 = vperm.slane %v937_v7, %v1604_v55  ;;  %v1067_v25 = vsel %vm244_vm0, %v1066_v22, %v1029_v59 }
 0x1f4   : > { %v845_v9 = vsel %vm244_vm0, %v829_v5, %v2373_v21  ;;  %1093 = vrot.lane.b32.xlu1 %v1063_v0, %s1460_s8  ;;  %1103 = vrot.lane.b32.xlu2 %v953_v2, %s1461_s16  ;;  %v843_v29 = vsel %vm244_vm0, %v842_v32, %v1948_v8  ;;  %v1069_v39 = vsel %vm244_vm0, %v1053_v58, %v1068_v6  ;;  %v2374_v53 = vrot.slane %v2044_v36, 4 }
 0x1f5   : > { %1089 = vrot.lane.b32.xlu0 %v839_v52, %s1460_s8  ;;  %v958_v43 = vrot.slane %v945_v41, 4  ;;  %v960_v44 = vrot.slane %v921_v14, 4  ;;  %v2375_v42 = vrot.slane %v1994_v35, 4  ;;  %v1072_v36 = vrot.slane %v1033_v48, 4  ;;  %s1399_s8 = sshra.s32 %s1225_s5, 4  ;;  %s1400_s8 = int_to_ptr.hbm [resolvable:$true] %s1399_s8 }
 0x1f6   : > { %v1049_v30 = vsel %vm244_vm0, %v2069_v11, %v2374_v53  ;;  %v2376_v11 = vrot.slane %v2010_v62, 4  ;;  %v2264_v23 = vsel %vm244_vm0, %v1058_v33, %v2138_v24  ;;  %v947_v37 = vsel %vm244_vm0, %v946_v54, %v2152_v4  ;;  %s1401_s13 = scalar_lea.hbm %s1400_s8, 24  ;;  %p1406_p0 = scmp.lt.s32.totalorder %s1400_s8, %s2365_s1 }
 0x1f7   : > { %v825_v51 = vsel %vm244_vm0, %v1981_v49, %v2375_v42  ;;  %v1057_v8 = vperm.slane %v1049_v30, %v1604_v55  ;;  %v959_v49 = vsel %vm244_vm0, %v958_v43, %v921_v14  ;;  %v961_v50 = vsel %vm244_vm0, %v945_v41, %v960_v44  ;;  %p1402_p11 = scmp.ne.s32.totalorder %s1400_s8, %s1401_s13 }
 0x1f8   : > { %v833_v40 = vperm.slane %v825_v51, %v1604_v55  ;;  %v835_v35 = vsel %vm244_vm0, %v2376_v11, %v1967_v3  ;;  %v2377_v62 = vrot.slane %v1935_v47, 4  ;;  %v2378_v61 = vperm.slane %v1863_v34, %v1859_v13 }
 0x1f9   : > { %v1070_v55 = vrot.slane %v1057_v8, 4  ;;  %v1073_v15 = vsel %vm244_vm0, %v1057_v8, %v1072_v36  ;;  %v2379_v24 = vperm.slane %v1870_v60, %v1859_v13  ;;  %v840_v33 = vrot.slane %v1960_v19, 4  ;;  %p1403_p12 = pnand %p1402_p11, %p1521_p5 }
 0x1fa   : > { %v846_v27 = vrot.slane %v833_v40, 4  ;;  %v849_v3 = vsel %vm244_vm0, %v833_v40, %v2377_v62  ;;  %v723_v0 = vsel %vm715_vm8, %v2378_v61, %v2163_v56  ;;  %v1065_v34 = vsel %vm244_vm0, %v2169_v31, %v1064_v63 }
 0x1fb   : > { %v730_v4 = vsel %vm715_vm8, %v2379_v24, %v2146_v10  ;;  %v1071_v54 = vsel %vm244_vm0, %v1070_v55, %v1033_v48  ;;  %736 = vst.msk [vmem:[%s2249_s17 + $0x8] sm:$0xff] %vm734_vm9, %v723_v0  ;;  %v841_v13 = vsel %vm244_vm0, %v2066_v18, %v840_v33  ;;  %p1404_p13 = pneg %p1403_p12 }
 0x1fc   : > { %v847_v2 = vsel %vm244_vm0, %v846_v27, %v1935_v47  ;;  %737 = vst.msk [vmem:[%s2249_s17 + $0x10] sm:$0xff] %vm734_vm9, %v730_v4  ;;  %1105 = vrot.lane.b32.xlu1 %v1065_v34, %s1461_s16  ;;  %1115 = vrot.lane.b32.xlu2 %v955_v20, %s1462_s23  ;;  %s1405_s17 = scalar_lea.hbm %s2365_s1, 48 }
 0x1fd   : > { %1101 = vrot.lane.b32.xlu0 %v841_v13, %s1461_s16  ;;  %p1407_p1 = scmp.lt.s32.totalorder %s1405_s17, %s1401_s13 }
 0x1ff   : > { %p1408_p2 = por %p1407_p1, %p1406_p0 }
 0x201   : > { %p1409_p3 = pnand %p1408_p2, %p1404_p13 }
 0x204   : > { %1117 = vrot.lane.b32.xlu1 %v1067_v25, %s1462_s23  ;;  %1127 = vrot.lane.b32.xlu2 %v957_v46, %s1463_s24 }
 0x205   : > { %1113 = vrot.lane.b32.xlu0 %v843_v29, %s1462_s23 }
 0x20c   : > { %1129 = vrot.lane.b32.xlu1 %v1069_v39, %s1463_s24  ;;  %1139 = vrot.lane.b32.xlu2 %v959_v49, %s1464_s25 }
 0x20d   : > { %1125 = vrot.lane.b32.xlu0 %v845_v9, %s1463_s24 }
 0x214   : > { %1141 = vrot.lane.b32.xlu1 %v1071_v54, %s1464_s25  ;;  %1151 = vrot.lane.b32.xlu2 %v961_v50, %s1465_s26 }
 0x215   : > { %1137 = vrot.lane.b32.xlu0 %v847_v2, %s1464_s25 }
 0x21c   : > { %1153 = vrot.lane.b32.xlu1 %v1073_v15, %s1465_s26 }
 0x21d   : > { %1149 = vrot.lane.b32.xlu0 %v849_v3, %s1465_s26 }
 0x233   : > { %v1078_v60 = vpop.permute.xlu2 %1077 }
 0x234   : > { %v1158_v47 = vsel %vm580_vm1, %v835_v35, %v1078_v60 }
 0x246   : > { %v1092_v19 = vpop.permute.xlu2 %1091 }
 0x24e   : > { %v1104_v18 = vpop.permute.xlu2 %1103 }
 0x256   : > { %v1116_v10 = vpop.permute.xlu2 %1115 }
 0x25e   : > { %v1082_v56 = vpop.permute.xlu1 %1081  ;;  %v1128_v31 = vpop.permute.xlu2 %1127 }
 0x25f   : > { %v1080_v63 = vpop.permute.xlu0 %1079  ;;  %v1160_v14 = vsel %vm580_vm1, %v2264_v23, %v1082_v56 }
 0x260   : > { %v1159_v28 = vsel %vm580_vm1, %v947_v37, %v1080_v63 }
 0x261   : > { %v1163_v52 = vsel %vm1161_vm10, %v1159_v28, %v1092_v19 }
 0x262   : > { %v1167_v26 = vsel %vm1165_vm11, %v1163_v52, %v1104_v18 }
 0x263   : > { %v1170_v17 = vsel %vm734_vm9, %v1167_v26, %v1116_v10 }
 0x264   : > { %v1174_v59 = vsel %vm1172_vm12, %v1170_v17, %v1128_v31 }
 0x266   : > { %v1094_v1 = vpop.permute.xlu1 %1093  ;;  %v1140_v38 = vpop.permute.xlu2 %1139 }
 0x267   : > { %v1090_v12 = vpop.permute.xlu0 %1089  ;;  %v1178_v58 = vsel %vm1176_vm13, %v1174_v59, %v1140_v38  ;;  %v1164_v41 = vsel %vm1161_vm10, %v1160_v14, %v1094_v1 }
 0x26e   : > { %v1106_v5 = vpop.permute.xlu1 %1105  ;;  %v1152_v46 = vpop.permute.xlu2 %1151 }
 0x26f   : > { %v1102_v57 = vpop.permute.xlu0 %1101  ;;  %v1182_v45 = vsel %vm1180_vm14, %v1178_v58, %v1152_v46 }
 0x270   : > { %1189 = vrot.lane.b32.xlu2 %v1182_v45, %s1466_s27 }
 0x276   : > { %v1118_v7 = vpop.permute.xlu1 %1117 }
 0x277   : > { %v1114_v16 = vpop.permute.xlu0 %1113 }
 0x27e   : > { %v1130_v20 = vpop.permute.xlu1 %1129 }
 0x27f   : > { %v1126_v22 = vpop.permute.xlu0 %1125 }
 0x286   : > { %v1142_v32 = vpop.permute.xlu1 %1141 }
 0x287   : > { %v1138_v6 = vpop.permute.xlu0 %1137 }
 0x288   : > { %1412 = shalt.err (!%p1409_p3)
}
 0x289   : > { %s1467_s7 = smov 128   ;;  %v1162_v21 = vsel %vm1161_vm10, %v1158_v47, %v1090_v12  ;;  %v1168_v9 = vsel %vm1165_vm11, %v1164_v41, %v1106_v5  ;;  %vm1196_vm15 = vcmask 130048   ;;  %s157_s26 = scalar_lea.vmem %s2366_s2, %s1320_s22  ;;  %vm1200_vm0 = vcmask 261120  }
 0x28a   : > { %1327 = dma.vmem_to_hbm [thread:$0]  (%p1521_p5), %s1223_s29, 384, %s1225_s5, %s1205_s6, %s1467_s7, %s1467_s7, %s1462_s23   ;;  %v1166_v48 = vsel %vm1165_vm11, %v1162_v21, %v1102_v57  ;;  %v1171_v25 = vsel %vm734_vm9, %v1168_v9, %v1118_v7 }
 0x28b   : > { %v1169_v29 = vsel %vm734_vm9, %v1166_v48, %v1114_v16  ;;  %v1175_v39 = vsel %vm1172_vm12, %v1171_v25, %v1130_v20 }
 0x28c   : > { %v1173_v43 = vsel %vm1172_vm12, %v1169_v29, %v1126_v22  ;;  %v1179_v53 = vsel %vm1176_vm13, %v1175_v39, %v1142_v32 }
 0x28d   : > { %v1177_v44 = vsel %vm1176_vm13, %v1173_v43, %v1138_v6 }
 0x28e   : > { %v1154_v30 = vpop.permute.xlu1 %1153 }
 0x28f   : > { %v1183_v42 = vsel %vm1180_vm14, %v1179_v53, %v1154_v30  ;;  %v1150_v51 = vpop.permute.xlu0 %1149 }
 0x290   : > { %1191 = vrot.lane.b32.xlu1 %v1183_v42, %s1466_s27  ;;  %v1181_v8 = vsel %vm1180_vm14, %v1177_v44, %v1150_v51 }
 0x291   : > { %1187 = vrot.lane.b32.xlu0 %v1181_v8, %s1466_s27 }
 0x2ca   : > { %v1190_v40 = vpop.permute.xlu2 %1189 }
 0x2cb   : > { %v1198_v36 = vsel %vm1196_vm15, %v1182_v45, %v1190_v40 }
 0x2cc   : > { %1202 = vst.msk [vmem:[%s157_s26 + $0x8] sm:$0xff] %vm1200_vm0, %v1198_v36 }
 0x302   : > { %v1192_v11 = vpop.permute.xlu1 %1191 }
 0x303   : > { %v1199_v35 = vsel %vm1196_vm15, %v1183_v42, %v1192_v11  ;;  %v1188_v49 = vpop.permute.xlu0 %1187 }
 0x304   : > { %1203 = vst.msk [vmem:[%s157_s26 + $0x10] sm:$0xff] %vm1200_vm0, %v1199_v35  ;;  %v1197_v50 = vsel %vm1196_vm15, %v1181_v8, %v1188_v49 }
 0x305   : > { %1201 = vst.msk [vmem:[%s157_s26] sm:$0xff] %vm1200_vm0, %v1197_v50 }
 0x306 PF: > { %p1333_p4 = scmp.ge.s32.totalorder %s1447_s12, 2  ;;  %s1243_s21 = sand.u32 1, %s1435_s9  }
 0x307   : > { %s1244_s22 = scalar_lea.sflag [#allocation3], %s1243_s21 }
 0x308   : > { %p1330_p5 = pnand %p1333_p4, %p1525_p6 }
 0x30a   : > { %p1331_p7 = pneg %p1330_p5 }
 0x30c   : > { %1430 = dma.done.wait (%p1331_p7), %s1244_s22, 384  }
 0x30d   : > { %1432 = vsyncadd (%p1331_p7), %s1244_s22, 4294966912  ;;  %p13_p8 = scmp.ge.s32.totalorder %s1508_s15, 4   ;;  %s2380_s9 = smov %s1439_s10 }
 0x30e   : > { %s2381_s10 = smov %s1443_s11  ;;  %s2382_s11 = smov %s1519_s18 }
 0x30f   : > { %s2383_s12 = smov %s1508_s15  ;;  %15 = sbr.rel (!%p13_p8) target bundleno = 3 (0x3), region = 71 }
 0x314   :  { %1258 = vsyncpa [#allocation3], 1 }
 0x315   :  { %1260 = vsyncpa [#allocation3 + $0x1], 1 }

</bundles_post_ra>
